<compile_context>
chip_gen: v7x
topology: tpu7x:2x2x1
jax: 0.10.0
libtpu: 0.0.40
codegen_flags: <defaults>
</compile_context>

<pallas_src>
import functools

import jax
import jax.numpy as jnp
from jax.experimental import pallas as pl
from jax.experimental.pallas import tpu as pltpu

_LANES = 128
_ACC_SUB = 32  # sublanes of the per-block partial-sum accumulator


def _round_up(x: int, m: int) -> int:
    return ((x + m - 1) // m) * m


def _stable_softplus(x):
    # softplus(x) = max(x, 0) + log1p(exp(-|x|))  (numerically stable)
    return jnp.maximum(x, 0.0) + jnp.log1p(jnp.exp(-jnp.abs(x)))


def _bpr_partial_kernel(pos_ref, neg_ref, out_ref, *, rows_total, mask_last):
    tile_rows, lanes = pos_ref.shape

    # Hot path: per-vreg upcast (native-dtype DMA), softplus(neg - pos).
    x = neg_ref[...].astype(jnp.float32) - pos_ref[...].astype(jnp.float32)
    sp = _stable_softplus(x)

    def _accumulate(vals):
        # (tile_rows,128) -> (tile_rows/32, 32, 128) -> (32,128): 4 parallel
        # sublane-group accumulators instead of one deep serial vreg chain.
        out_ref[...] = vals.reshape(-1, _ACC_SUB, lanes).sum(axis=0)

    if mask_last:
        i = pl.program_id(0)
        last = pl.num_programs(0) - 1

        @pl.when(i != last)
        def _():
            _accumulate(sp)

        @pl.when(i == last)
        def _():
            # Row-level validity check (no element-index arithmetic -> no
            # int32 overflow for huge inputs). Out-of-bounds rows of the last
            # block hold garbage; jnp.where selects 0.0 there before the sum.
            row_ids = jax.lax.broadcasted_iota(jnp.int32, sp.shape, 0)
            valid = (i * tile_rows + row_ids) < rows_total
            _accumulate(jnp.where(valid, sp, 0.0))
    else:
        _accumulate(sp)


def bpr_loss(pos_preds: jax.Array, neg_preds: jax.Array, *,
             tile_rows: int = 1024, min_pallas_elems: int = 65536):
    """Bayesian Personalized Ranking loss: mean(softplus(neg_preds - pos_preds))."""
    assert pos_preds.shape == neg_preds.shape
    n_total = int(pos_preds.size)
    if n_total == 0:
        return jnp.float32(jnp.nan)

    pos_flat = pos_preds.reshape(-1)   # zero-copy for contiguous inputs
    neg_flat = neg_preds.reshape(-1)

    # Tiny inputs: fused XLA elementwise+reduce beats per-call kernel overhead.
    if n_total < max(min_pallas_elems, _LANES):
        x = neg_flat.astype(jnp.float32) - pos_flat.astype(jnp.float32)
        return jnp.mean(_stable_softplus(x))

    rows = n_total // _LANES
    n_main = rows * _LANES

    # Lane tail (< 128 elems): handled outside the kernel so the kernel inputs
    # remain a zero-copy (rows, 128) view — no whole-array pad/cast pass.
    if n_main != n_total:
        pos_tail = pos_flat[n_main:].astype(jnp.float32)
        neg_tail = neg_flat[n_main:].astype(jnp.float32)
        tail_sum = jnp.sum(_stable_softplus(neg_tail - pos_tail))
        pos_main, neg_main = pos_flat[:n_main], neg_flat[:n_main]
    else:
        tail_sum = jnp.float32(0.0)
        pos_main, neg_main = pos_flat, neg_flat

    pos2d = pos_main.reshape(rows, _LANES)
    neg2d = neg_main.reshape(rows, _LANES)

    # Tile sizing: multiple of the accumulator height (also satisfies the bf16
    # (16,128) min tile), capped so the grid has >= 2 blocks when possible
    # (v7x megacore sharding), default kept modest for v5e's scoped-VMEM limit.
    tr = min(tile_rows, _round_up(pl.cdiv(rows, 2), _ACC_SUB))
    tr = max(_ACC_SUB, _round_up(tr, _ACC_SUB))
    num_blocks = pl.cdiv(rows, tr)
    mask_last = (rows % tr) != 0

    in_bytes = 2 * n_main * pos_main.dtype.itemsize
    out_bytes = num_blocks * _ACC_SUB * _LANES * 4
    cost = pl.CostEstimate(flops=6 * n_main,
                           transcendentals=2 * n_main,
                           bytes_accessed=in_bytes + out_bytes)

    kernel = functools.partial(_bpr_partial_kernel,
                               rows_total=rows, mask_last=mask_last)

    partials = pl.pallas_call(
        kernel,
        out_shape=jax.ShapeDtypeStruct((num_blocks * _ACC_SUB, _LANES), jnp.float32),
        grid_spec=pltpu.PrefetchScalarGridSpec(
            num_scalar_prefetch=0,
            grid=(num_blocks,),
            in_specs=[
                pl.BlockSpec((tr, _LANES), lambda i: (i, 0)),
                pl.BlockSpec((tr, _LANES), lambda i: (i, 0)),
            ],
            out_specs=pl.BlockSpec((_ACC_SUB, _LANES), lambda i: (i, 0)),
        ),
        compiler_params=pltpu.CompilerParams(
            dimension_semantics=("parallel",),
        ),
        cost_estimate=cost,
    )(pos2d, neg2d)

    # Tiny final reduction + mean outside the kernel.
    return (jnp.sum(partials) + tail_sum) / jnp.float32(n_total)


if __name__ == "__main__":
    key = jax.random.PRNGKey(0)
    k1, k2, k3, k4, k5, k6 = jax.random.split(key, 6)

    def ref_loss(p, n):
        x = n.astype(jnp.float32) - p.astype(jnp.float32)
        return jnp.mean(jnp.maximum(x, 0.0) + jnp.log1p(jnp.exp(-jnp.abs(x))))

    # 1) Main Pallas path (f32, lane-aligned): 512 users x 128 negatives.
    pos = jax.random.normal(k1, (512, 128), dtype=jnp.float32)
    neg = jax.random.normal(k2, (512, 128), dtype=jnp.float32)
    out = bpr_loss(pos, neg)
    jax.block_until_ready(out)
    assert jnp.allclose(out, ref_loss(pos, neg), atol=1e-5, rtol=1e-5), (out, ref_loss(pos, neg))

    # 2) Ragged size: exercises masked last block + lane tail.
    pos_r = jax.random.normal(k3, (70001,), dtype=jnp.float32)
    neg_r = jax.random.normal(k4, (70001,), dtype=jnp.float32)
    out_r = bpr_loss(pos_r, neg_r)
    jax.block_until_ready(out_r)
    assert jnp.allclose(out_r, ref_loss(pos_r, neg_r), atol=1e-5, rtol=1e-5), (out_r, ref_loss(pos_r, neg_r))

    # 3) bf16 inputs: DMA'd as bf16 (half HBM traffic), upcast per block in-kernel.
    pos_b = jax.random.normal(k5, (512, 128), dtype=jnp.bfloat16)
    neg_b = jax.random.normal(k6, (512, 128), dtype=jnp.bfloat16)
    out_b = bpr_loss(pos_b, neg_b)
    jax.block_until_ready(out_b)
    assert jnp.allclose(out_b, ref_loss(pos_b, neg_b), atol=1e-4, rtol=1e-4), (out_b, ref_loss(pos_b, neg_b))

    # 4) Tiny ranking batch: plain-jnp fallback path.
    pos_s = jax.random.normal(k1, (32, 16), dtype=jnp.float32)
    neg_s = jax.random.normal(k2, (32, 16), dtype=jnp.float32)
    out_s = bpr_loss(pos_s, neg_s)
    jax.block_until_ready(out_s)
    assert jnp.allclose(out_s, ref_loss(pos_s, neg_s), atol=1e-5, rtol=1e-5), (out_s, ref_loss(pos_s, neg_s))

    # 5) Force the Pallas path at a genuinely small shape too (kernel still runs).
    pos_f = jax.random.normal(k3, (32, 128), dtype=jnp.float32)
    neg_f = jax.random.normal(k4, (32, 128), dtype=jnp.float32)
    out_f = bpr_loss(pos_f, neg_f, min_pallas_elems=0)
    jax.block_until_ready(out_f)
    assert jnp.allclose(out_f, ref_loss(pos_f, neg_f), atol=1e-5, rtol=1e-5), (out_f, ref_loss(pos_f, neg_f))

    print("KERNEL_OK")
</pallas_src>

<mosaic_0001>
module attributes {stable_mosaic.version = 11 : i64} {
  func.func @_bpr_partial_kernel(%arg0: i32, %arg1: memref<256x128xf32, #tpu.memory_space<vmem>>, %arg2: memref<256x128xf32, #tpu.memory_space<vmem>>, %arg3: memref<32x128xf32, #tpu.memory_space<vmem>>) attributes {dimension_semantics = [#tpu.dimension_semantics<parallel>], iteration_bounds = array<i64: 2>, scalar_prefetch = 0 : i64, scratch_operands = 0 : i64, tpu.core_type = #tpu.core_type<tc>, window_params = [{transform_indices = @transform_0, window_bounds = array<i64: 256, 128>}, {transform_indices = @transform_1, window_bounds = array<i64: 256, 128>}, {transform_indices = @transform_2, window_bounds = array<i64: 32, 128>}]} {
    %c0 = arith.constant 0 : index
    %c0_0 = arith.constant 0 : index
    %0 = vector.load %arg2[%c0, %c0_0] : memref<256x128xf32, #tpu.memory_space<vmem>>, vector<256x128xf32>
    %c0_1 = arith.constant 0 : index
    %c0_2 = arith.constant 0 : index
    %1 = vector.load %arg1[%c0_1, %c0_2] : memref<256x128xf32, #tpu.memory_space<vmem>>, vector<256x128xf32>
    %2 = arith.subf %0, %1 : vector<256x128xf32>
    %cst = arith.constant 0.000000e+00 : f32
    %3 = vector.broadcast %cst : f32 to vector<256x128xf32>
    %4 = arith.maximumf %2, %3 : vector<256x128xf32>
    %5 = math.absf %2 : vector<256x128xf32>
    %cst_3 = arith.constant 0.000000e+00 : f32
    %6 = vector.broadcast %cst_3 : f32 to vector<256x128xf32>
    %7 = arith.subf %6, %5 : vector<256x128xf32>
    %8 = math.exp %7 : vector<256x128xf32>
    %9 = math.log1p %8 : vector<256x128xf32>
    %10 = arith.addf %4, %9 : vector<256x128xf32>
    %11 = vector.shape_cast %10 : vector<256x128xf32> to vector<8x32x128xf32>
    %cst_4 = arith.constant dense<0.000000e+00> : vector<32x128xf32>
    %12 = vector.multi_reduction <add>, %11, %cst_4 [0] : vector<8x32x128xf32> to vector<32x128xf32>
    %c0_5 = arith.constant 0 : index
    %c0_6 = arith.constant 0 : index
    %13 = vector.load %arg3[%c0_5, %c0_6] : memref<32x128xf32, #tpu.memory_space<vmem>>, vector<32x128xf32>
    tpu.vector_store %arg3[%c0_5, %c0_6], %12 {strides = array<i32>} : memref<32x128xf32, #tpu.memory_space<vmem>>, vector<32x128xf32>,
    return
  }
  func.func @transform_0(%arg0: i32) -> (i32, i32) {
    %c0_i32 = arith.constant 0 : i32
    %c0_i32_0 = arith.constant 0 : i32
    return %arg0, %c0_i32 : i32, i32
  }
  func.func @transform_1(%arg0: i32) -> (i32, i32) {
    %c0_i32 = arith.constant 0 : i32
    %c0_i32_0 = arith.constant 0 : i32
    return %arg0, %c0_i32 : i32, i32
  }
  func.func @transform_2(%arg0: i32) -> (i32, i32) {
    %c0_i32 = arith.constant 0 : i32
    %c0_i32_0 = arith.constant 0 : i32
    return %arg0, %c0_i32 : i32, i32
  }
}

</mosaic_0001>

<bundles_post_ra>
// kernel: tpu_custom_call.1
= control target key start
LH: loop header
LB: loop body
LE: loop exit
PB: predicated region body
PF: predicated region fallthrough
CT: control target
= control target key end

     0   :  { %7 = vsyncpa [#allocation3], 0  ;;  %s2460_s0 = inlined_call_operand.hbm [shape: f32[512,128], index: 0, kind: input, shape index: {}]   ;;  %s2461_s1 = inlined_call_operand.hbm [shape: f32[512,128], index: 1, kind: input, shape index: {}]   ;;  %s2462_s2 = inlined_call_operand.hbm [shape: f32[64,128], index: 2, kind: output, shape index: {}]  }
   0x1   :  { %9 = vsyncpa [#allocation3 + $0x1], 0 }
   0x2   :  { %10 = vsyncpa [#allocation6], 0 }
   0x3   :  { %12 = vsyncpa [#allocation6 + $0x1], 0 }
   0x4   :  { %13 = vsyncpa [#allocation4], 0 }
   0x5   :  { %15 = vsyncpa [#allocation4 + $0x1], 0  ;;  %s1281_s9 = smov 0   ;;  %s1283_s10 = smov 0  }
   0x6   :  { %s1285_s11 = smov 0   ;;  %s1287_s12 = smov 0  }
   0x7 LB: > { %s1302_s13 = sadd.s32 4294967295, %s1257_s12   ;;  %s923_s14 = sadd.s32 4294967294, %s1257_s12   ;;  %s1257_s12 = sphi %s1287_s12, %s2861_s12   ;;  %s1253_s11 = sphi %s1285_s11, %s2860_s11   ;;  %s1249_s10 = sphi %s1283_s10, %s2859_s10   ;;  %s1245_s9 = sphi %s1281_s9, %s2858_s9  }
   0x8   : > { %s1306_s15 = sadd.s32 1, %s1257_s12   ;;  %s28_s16 = sadd.s32 1, %s1253_s11 }
   0x9   : > { %s25_s17 = ssub.s32 %s1257_s12, %s1306_s15  ;;  %p35_p0 = scmp.ne.s32.totalorder %s1253_s11, %s1249_s10 }
   0xa   : > { %p26_p1 = scmp.eq.s32.totalorder %s25_s17, 0  ;;  %p36_p2 = scmp.eq.s32.totalorder %s1257_s12, 0 }
   0xb   : > { %p41_p3 = scmp.ne.s32.totalorder %s1249_s10, %s1245_s9  ;;  %p42_p4 = scmp.eq.s32.totalorder %s1302_s13, 0 }
   0xc   : > { %s1318_s18 = scalar_select %p26_p1, %s1253_s11, %s28_s16  }
   0xd   : > { %p1320_p5 = por %p36_p2, %p35_p0  ;;  %p1324_p6 = por %p42_p4, %p41_p3 }
   0xe   : > { %p91_p7 = scmp.eq.s32.totalorder %s1302_s13, 1  ;;  %p97_p8 = scmp.eq.s32.totalorder %s923_s14, 1 }
   0xf   : > { %s2555_s20 = scalar_select %p1324_p6, 1, 0 }
  0x10   : > { %p961_p10 = scmp.lt.s32.totalorder %s1257_s12, 2  ;;  %p1331_p11 = por %p91_p7, %p35_p0 }
  0x11   : > { %p1335_p12 = por %p97_p8, %p41_p3  ;;  %s1340_s23 = sand.u32 1, %s1253_s11  }
  0x12   : > { %s2556_s21 = scalar_select %p1331_p11, 1, 0 }
  0x13   : > { %s2557_s22 = scalar_select %p1335_p12, 1, 0 }
  0x14   : > { %s941_s24 = sshll.u32 %s1257_s12, 12  ;;  %s926_s25 = sshll.u32 %s1340_s23, 8 }
  0x15   : > { %s1349_s28 = scalar_lea.hbm %s2460_s0, %s941_s24  ;;  %s121_s29 = scalar_lea.vmem [#allocation2], %s926_s25 }
  0x16   : > { %s128_s30 = sshll.u32 %s121_s29, 4  ;;  %p1355_p13 = pnand %p961_p10, %p1320_p5  ;;  %s1359_s30 = int_to_ptr.vmem [resolvable:$true] %s128_s30 }
  0x17   : > { %s118_s4 = scalar_lea.sflag [#allocation3], %s1340_s23  ;;  %s1127_s5 = scalar_lea.hbm %s1349_s28, 4096 }
  0x18   : > { %p1128_p0 = scmp.ne.s32.totalorder %s1349_s28, %s1127_s5  ;;  %p1129_p1 = pneg %p1355_p13 }
  0x19   : > { %s1132_s8 = scalar_lea.hbm %s2460_s0, 8192  ;;  %p1133_p4 = scmp.lt.u32.totalorder %s1349_s28, %s2460_s0 }
  0x1a   : > { %p1130_p2 = pnand %p1129_p1, %p1128_p0  ;;  %p1134_p5 = scmp.lt.u32.totalorder %s1132_s8, %s1127_s5 }
  0x1b   : > { %p1136_p8 = scmp.lt.u32.totalorder %s1127_s5, %s1349_s28 }
  0x1c   : > { %p1131_p3 = pneg %p1130_p2  ;;  %p1135_p7 = por %p1134_p5, %p1133_p4 }
  0x1e   : > { %p1137_p10 = por %p1136_p8, %p1135_p7 }
  0x20   : > { %p1138_p9 = pnand %p1137_p10, %p1131_p3 }
  0x22   : > { %1141 = shalt.err (!%p1138_p9)
}
  0x23   : > { %s1142_s17 = scalar_lea.vmem %s1359_s30, 4096  ;;  %s1259_s19 = smov [#allocation2]  }
  0x24   : > { %p1143_p0 = scmp.ne.s32.totalorder %s1359_s30, %s1142_s17  ;;  %s1147_s26 = sshll.u32 %s1259_s19, 4  ;;  %s1148_s26 = int_to_ptr.vmem [resolvable:$false] %s1147_s26 }
  0x25   : > { %s1149_s27 = scalar_lea.vmem %s1148_s26, 8192  ;;  %p1150_p11 = scmp.lt.s32.totalorder %s1359_s30, %s1148_s26 }
  0x26   : > { %p1145_p2 = pnand %p1143_p0, %p1129_p1  ;;  %p1151_p4 = scmp.lt.s32.totalorder %s1149_s27, %s1142_s17 }
  0x28   : > { %p1146_p12 = pneg %p1145_p2  ;;  %p1152_p5 = por %p1151_p4, %p1150_p11 }
  0x2a   : > { %p1153_p7 = pnand %p1152_p5, %p1146_p12 }
  0x2c   : > { %1156 = shalt.err (!%p1153_p7)
}
  0x2d   : > { %s1260_s29 = smov 128   ;;  %s1261_s5 = smov 8  }
  0x2e   : > { %953 = dma.hbm_to_vmem [thread:$0]  (!%p1355_p13), %s1349_s28, 4096, %s1359_s30, %s118_s4, %s1260_s29, %s1260_s29, %s1261_s5  }
  0x2f   : > { %p932_p9 = scmp.ge.s32.totalorder %s1257_s12, 1  ;;  %p157_p11 = scmp.lt.s32.totalorder %s1257_s12, 3 }
  0x30   : > { %s1403_s14 = scalar_lea.hbm %s2461_s1, %s941_s24  ;;  %s142_s16 = scalar_lea.vmem [#allocation5], %s926_s25 }
  0x31   : > { %p1394_p12 = pnand %p932_p9, %p157_p11  ;;  %s149_s17 = sshll.u32 %s142_s16, 4  ;;  %s1407_s17 = int_to_ptr.vmem [resolvable:$true] %s149_s17 }
  0x32   : > { %s139_s28 = scalar_lea.sflag [#allocation6], %s1340_s23  ;;  %s1157_s30 = scalar_lea.hbm %s1403_s14, 4096 }
  0x33   : > { %p1158_p3 = scmp.ne.s32.totalorder %s1403_s14, %s1157_s30  ;;  %s1162_s24 = scalar_lea.hbm %s2461_s1, 8192 }
  0x34   : > { %p1163_p0 = scmp.lt.u32.totalorder %s1403_s14, %s2461_s1  ;;  %p1164_p2 = scmp.lt.u32.totalorder %s1162_s24, %s1157_s30 }
  0x35   : > { %p1160_p8 = pnand %p1158_p3, %p1129_p1  ;;  %p1166_p5 = scmp.lt.u32.totalorder %s1157_s30, %s1403_s14 }
  0x36   : > { %p1165_p4 = por %p1164_p2, %p1163_p0 }
  0x37   : > { %p1161_p10 = pneg %p1160_p8 }
  0x38   : > { %p1167_p7 = por %p1166_p5, %p1165_p4 }
  0x3a   : > { %p1168_p9 = pnand %p1167_p7, %p1161_p10 }
  0x3c   : > { %1171 = shalt.err (!%p1168_p9)
}
  0x3d   : > { %s1172_s25 = scalar_lea.vmem %s1407_s17, 4096  ;;  %s1262_s7 = smov [#allocation5]  }
  0x3e   : > { %p1173_p11 = scmp.ne.s32.totalorder %s1407_s17, %s1172_s25  ;;  %s1177_s8 = sshll.u32 %s1262_s7, 4  ;;  %s1178_s8 = int_to_ptr.vmem [resolvable:$false] %s1177_s8 }
  0x3f   : > { %s1179_s16 = scalar_lea.vmem %s1178_s8, 8192  ;;  %p1180_p6 = scmp.lt.s32.totalorder %s1407_s17, %s1178_s8 }
  0x40   : > { %p1175_p3 = pnand %p1173_p11, %p1129_p1  ;;  %p1181_p0 = scmp.lt.s32.totalorder %s1179_s16, %s1172_s25 }
  0x42   : > { %p1176_p8 = pneg %p1175_p3  ;;  %p1182_p2 = por %p1181_p0, %p1180_p6 }
  0x44   : > { %p1183_p4 = pnand %p1182_p2, %p1176_p8 }
  0x46   : > { %1186 = shalt.err (!%p1183_p4)
}
  0x47   : > { %956 = dma.hbm_to_vmem [thread:$0]  (!%p1355_p13), %s1403_s14, 4096, %s1407_s17, %s139_s28, %s1260_s29, %s1260_s29, %s1261_s5  }
  0x48   : > { %161 = sbr.rel (%p1394_p12) target bundleno = 266 (0x10a), region = 28 }
  0x4f   : > { %s1441_s30 = sand.u32 1, %s1249_s10   ;;  %p2560_p6 = scmp.ne.s32.totalorder %s2555_s20, 0 }
  0x50   : > { %s933_s4 = sshll.u32 %s1441_s30, 8  ;;  %s164_s19 = scalar_lea.sflag [#allocation3], %s1441_s30 }
  0x51   : > { %s1445_s3 = scalar_lea.vmem [#allocation2], %s933_s4 }
  0x52   : > { %1232 = dma.done.wait (%p2560_p6), %s164_s19, 4096  }
  0x53   : > { %1234 = vsyncadd (%p2560_p6), %s164_s19, 4294963200  ;;  %s173_s23 = scalar_lea.sflag [#allocation6], %s1441_s30  ;;  %s1452_s29 = scalar_lea.vmem [#allocation5], %s933_s4 }
  0x54   : > { %1236 = dma.done.wait (%p2560_p6), %s173_s23, 4096  }
  0x55   : > { %1238 = vsyncadd (%p2560_p6), %s173_s23, 4294963200  ;;  %v205_v0 = vld [vmem:[%s1452_s29] sm:$0xff]  ;;  %v206_v1 = vld [vmem:[%s1452_s29 + $0x8] sm:$0xff]  ;;  %s935_s20 = sshll.u32 %s1441_s30, 5  ;;  %s943_s5 = sshll.u32 %s1302_s13, 9 }
  0x56   : > { %v207_v2 = vld [vmem:[%s1452_s29 + $0x10] sm:$0xff]  ;;  %v208_v3 = vld [vmem:[%s1452_s29 + $0x18] sm:$0xff]  ;;  %v209_v4 = vld [vmem:[%s1452_s29 + $0x20] sm:$0xff]  ;;  %s201_s6 = scalar_lea.vmem [#allocation7], %s935_s20  ;;  %s2414_s24 = scalar_lea.hbm %s2462_s2, %s943_s5 }
  0x57   : > { %v210_v5 = vld [vmem:[%s1452_s29 + $0x28] sm:$0xff]  ;;  %v211_v6 = vld [vmem:[%s1452_s29 + $0x30] sm:$0xff]  ;;  %v237_v7 = vld [vmem:[%s1445_s3] sm:$0xff]  ;;  %s827_s14 = sshll.u32 %s201_s6, 4  ;;  %s814_s13 = scalar_lea.sflag [#allocation4], %s1441_s30  ;;  %s2416_s14 = int_to_ptr.vmem [resolvable:$true] %s827_s14 }
  0x58   : > { %v212_v8 = vld [vmem:[%s1452_s29 + $0x38] sm:$0xff]  ;;  %v213_v9 = vld [vmem:[%s1452_s29 + $0x40] sm:$0xff]  ;;  %v214_v10 = vld [vmem:[%s1452_s29 + $0x48] sm:$0xff]  ;;  %v1490_v32 = vsub.f32 %v205_v0, %v237_v7  ;;  %s1187_s26 = scalar_lea.vmem %s2416_s14, 512  ;;  %p2855_p1 = scmp.ne.s32.totalorder %s2556_s21, 0 }
  0x59   : > { %v238_v11 = vld [vmem:[%s1445_s3 + $0x8] sm:$0xff]  ;;  %v239_v12 = vld [vmem:[%s1445_s3 + $0x10] sm:$0xff]  ;;  %v240_v13 = vld [vmem:[%s1445_s3 + $0x18] sm:$0xff]  ;;  %p1188_p13 = scmp.ne.s32.totalorder %s2416_s14, %s1187_s26  ;;  %s1263_s27 = smov [#allocation7]  }
  0x5a   : > { %v215_v14 = vld [vmem:[%s1452_s29 + $0x50] sm:$0xff]  ;;  %v216_v15 = vld [vmem:[%s1452_s29 + $0x58] sm:$0xff]  ;;  %v217_v16 = vld [vmem:[%s1452_s29 + $0x60] sm:$0xff]  ;;  %2561 = vst [vmem:[#allocation11_spill] sm:$0xff] %v1490_v32  ;;  %v1492_v33 = vsub.f32 %v206_v1, %v238_v11  ;;  %v1494_v34 = vsub.f32 %v207_v2, %v239_v12  ;;  %v1502_v41 = vsub.f32 %v208_v3, %v240_v13  ;;  %s1191_s25 = sshll.u32 %s1263_s27, 4  ;;  %s1192_s25 = int_to_ptr.vmem [resolvable:$false] %s1191_s25 }
  0x5b   : > { %v241_v17 = vld [vmem:[%s1445_s3 + $0x20] sm:$0xff]  ;;  %v242_v18 = vld [vmem:[%s1445_s3 + $0x28] sm:$0xff]  ;;  %v243_v19 = vld [vmem:[%s1445_s3 + $0x30] sm:$0xff]  ;;  %p1189_p12 = pnand %p1188_p13, %p2855_p1  ;;  %s1193_s7 = scalar_lea.vmem %s1192_s25, 1024 }
  0x5c   : > { %v218_v20 = vld [vmem:[%s1452_s29 + $0x68] sm:$0xff]  ;;  %v219_v21 = vld [vmem:[%s1452_s29 + $0x70] sm:$0xff]  ;;  %v220_v22 = vld [vmem:[%s1452_s29 + $0x78] sm:$0xff]  ;;  %2562 = vst [vmem:[#allocation12_spill] sm:$0xff] %v1492_v33  ;;  %v1504_v42 = vsub.f32 %v209_v4, %v241_v17  ;;  %v1506_v43 = vsub.f32 %v210_v5, %v242_v18  ;;  %v1508_v44 = vsub.f32 %v211_v6, %v243_v19  ;;  %p1194_p5 = scmp.lt.s32.totalorder %s2416_s14, %s1192_s25  ;;  %p1195_p7 = scmp.lt.s32.totalorder %s1193_s7, %s1187_s26 }
  0x5d   : > { %v244_v23 = vld [vmem:[%s1445_s3 + $0x38] sm:$0xff]  ;;  %v245_v24 = vld [vmem:[%s1445_s3 + $0x40] sm:$0xff]  ;;  %v246_v25 = vld [vmem:[%s1445_s3 + $0x48] sm:$0xff]  ;;  %2563 = vst [vmem:[#allocation13_spill] sm:$0xff] %v1494_v34  ;;  %p1190_p10 = pneg %p1189_p12 }
  0x5e   : > { %v221_v26 = vld [vmem:[%s1452_s29 + $0x80] sm:$0xff]  ;;  %v222_v27 = vld [vmem:[%s1452_s29 + $0x88] sm:$0xff]  ;;  %v223_v28 = vld [vmem:[%s1452_s29 + $0x90] sm:$0xff]  ;;  %2564 = vst [vmem:[#allocation14_spill] sm:$0xff] %v1502_v41  ;;  %v1516_v51 = vsub.f32 %v212_v8, %v244_v23  ;;  %v1518_v52 = vsub.f32 %v213_v9, %v245_v24  ;;  %v1520_v53 = vsub.f32 %v214_v10, %v246_v25  ;;  %p1196_p9 = por %p1195_p7, %p1194_p5 }
  0x5f   : > { %v247_v29 = vld [vmem:[%s1445_s3 + $0x50] sm:$0xff]  ;;  %v248_v30 = vld [vmem:[%s1445_s3 + $0x58] sm:$0xff]  ;;  %v249_v31 = vld [vmem:[%s1445_s3 + $0x60] sm:$0xff]  ;;  %2565 = vst [vmem:[#allocation15_spill] sm:$0xff] %v1504_v42 }
  0x60   : > { %v224_v35 = vld [vmem:[%s1452_s29 + $0x98] sm:$0xff]  ;;  %v225_v36 = vld [vmem:[%s1452_s29 + $0xa0] sm:$0xff]  ;;  %v226_v37 = vld [vmem:[%s1452_s29 + $0xa8] sm:$0xff]  ;;  %2566 = vst [vmem:[#allocation16_spill] sm:$0xff] %v1506_v43  ;;  %v1529_v61 = vsub.f32 %v215_v14, %v247_v29  ;;  %v1531_v62 = vsub.f32 %v216_v15, %v248_v30  ;;  %v1533_v63 = vsub.f32 %v217_v16, %v249_v31  ;;  %p1197_p11 = pnand %p1196_p9, %p1190_p10 }
  0x61   : > { %v250_v38 = vld [vmem:[%s1445_s3 + $0x68] sm:$0xff]  ;;  %v251_v39 = vld [vmem:[%s1445_s3 + $0x70] sm:$0xff]  ;;  %v252_v40 = vld [vmem:[%s1445_s3 + $0x78] sm:$0xff]  ;;  %2567 = vst [vmem:[#allocation17_spill] sm:$0xff] %v1508_v44 }
  0x62   : > { %v227_v45 = vld [vmem:[%s1452_s29 + $0xb0] sm:$0xff]  ;;  %v228_v46 = vld [vmem:[%s1452_s29 + $0xb8] sm:$0xff]  ;;  %v229_v47 = vld [vmem:[%s1452_s29 + $0xc0] sm:$0xff]  ;;  %2568 = vst [vmem:[#allocation18_spill] sm:$0xff] %v1516_v51  ;;  %v1539_v4 = vsub.f32 %v218_v20, %v250_v38  ;;  %v1541_v5 = vsub.f32 %v219_v21, %v251_v39  ;;  %v1543_v6 = vsub.f32 %v220_v22, %v252_v40 }
  0x63   : > { %v253_v48 = vld [vmem:[%s1445_s3 + $0x80] sm:$0xff]  ;;  %v254_v49 = vld [vmem:[%s1445_s3 + $0x88] sm:$0xff]  ;;  %v255_v50 = vld [vmem:[%s1445_s3 + $0x90] sm:$0xff]  ;;  %2569 = vst [vmem:[#allocation19_spill] sm:$0xff] %v1518_v52 }
  0x64   : > { %2570 = vst [vmem:[#allocation20_spill] sm:$0xff] %v1520_v53  ;;  %v230_v55 = vld [vmem:[%s1452_s29 + $0xc8] sm:$0xff]  ;;  %v231_v56 = vld [vmem:[%s1452_s29 + $0xd0] sm:$0xff]  ;;  %v232_v57 = vld [vmem:[%s1452_s29 + $0xd8] sm:$0xff]  ;;  %v1549_v11 = vsub.f32 %v221_v26, %v253_v48  ;;  %v1551_v12 = vsub.f32 %v222_v27, %v254_v49  ;;  %v1553_v13 = vsub.f32 %v223_v28, %v255_v50  ;;  %v344_v49 = vand.u32 2147483647, %v1531_v62 }
  0x65   : > { %v256_v58 = vld [vmem:[%s1445_s3 + $0x98] sm:$0xff]  ;;  %v257_v59 = vld [vmem:[%s1445_s3 + $0xa0] sm:$0xff]  ;;  %v258_v60 = vld [vmem:[%s1445_s3 + $0xa8] sm:$0xff]  ;;  %2571 = vst [vmem:[#allocation21_spill] sm:$0xff] %v1529_v61  ;;  %v348_v39 = vand.u32 2147483647, %v1543_v6 }
  0x66   : > { %2572 = vst [vmem:[#allocation22_spill] sm:$0xff] %v1531_v62  ;;  %2573 = vst [vmem:[#allocation23_spill] sm:$0xff] %v1533_v63  ;;  %v259_v1 = vld [vmem:[%s1445_s3 + $0xb0] sm:$0xff]  ;;  %v260_v2 = vld [vmem:[%s1445_s3 + $0xb8] sm:$0xff]  ;;  %v1558_v17 = vsub.f32 %v224_v35, %v256_v58  ;;  %v1560_v18 = vsub.f32 %v225_v36, %v257_v59  ;;  %v1562_v19 = vsub.f32 %v226_v37, %v258_v60  ;;  %v337_v59 = vand.u32 2147483647, %v1504_v42 }
  0x67   : > { %v261_v3 = vld [vmem:[%s1445_s3 + $0xc0] sm:$0xff]  ;;  %2574 = vst [vmem:[#allocation24_spill] sm:$0xff] %v1539_v4  ;;  %2575 = vst [vmem:[#allocation25_spill] sm:$0xff] %v1541_v5  ;;  %v262_v8 = vld [vmem:[%s1445_s3 + $0xc8] sm:$0xff]  ;;  %v1565_v21 = vsub.f32 %v227_v45, %v259_v1  ;;  %v1567_v22 = vsub.f32 %v228_v46, %v260_v2  ;;  %v338_v1 = vand.u32 2147483647, %v1506_v43 }
  0x68   : > { %2576 = vst [vmem:[#allocation26_spill] sm:$0xff] %v1543_v6  ;;  %v263_v9 = vld [vmem:[%s1445_s3 + $0xd0] sm:$0xff]  ;;  %v264_v10 = vld [vmem:[%s1445_s3 + $0xd8] sm:$0xff]  ;;  %2577 = vst [vmem:[#allocation27_spill] sm:$0xff] %v1549_v11  ;;  %v1569_v23 = vsub.f32 %v229_v47, %v261_v3  ;;  %v1572_v25 = vsub.f32 %v230_v55, %v262_v8  ;;  %v333_v8 = vand.u32 2147483647, %v1490_v32 }
  0x69   : > { %2578 = vst [vmem:[#allocation28_spill] sm:$0xff] %v1551_v12  ;;  %2579 = vst [vmem:[#allocation29_spill] sm:$0xff] %v1553_v13  ;;  %v233_v15 = vld [vmem:[%s1452_s29 + $0xe0] sm:$0xff]  ;;  %v1574_v26 = vsub.f32 %v231_v56, %v263_v9  ;;  %v1576_v27 = vsub.f32 %v232_v57, %v264_v10  ;;  %v234_v36 = vld [vmem:[%s1452_s29 + $0xe8] sm:$0xff]  ;;  %v334_v9 = vand.u32 2147483647, %v1492_v33 }
  0x6a   : > { %v265_v16 = vld [vmem:[%s1445_s3 + $0xe0] sm:$0xff]  ;;  %2580 = vst [vmem:[#allocation30_spill] sm:$0xff] %v1558_v17  ;;  %2581 = vst [vmem:[#allocation31_spill] sm:$0xff] %v1560_v18  ;;  %v235_v37 = vld [vmem:[%s1452_s29 + $0xf0] sm:$0xff]  ;;  %v339_v2 = vand.u32 2147483647, %v1508_v44 }
  0x6b   : > { %2582 = vst [vmem:[#allocation32_spill] sm:$0xff] %v1562_v19  ;;  %2583 = vst [vmem:[#allocation33_spill] sm:$0xff] %v1565_v21  ;;  %v1579_v29 = vsub.f32 %v233_v15, %v265_v16  ;;  %v236_v46 = vld [vmem:[%s1452_s29 + $0xf8] sm:$0xff]  ;;  %v266_v47 = vld [vmem:[%s1445_s3 + $0xe8] sm:$0xff]  ;;  %v335_v15 = vand.u32 2147483647, %v1494_v34 }
  0x6c   : > { %2584 = vst [vmem:[#allocation34_spill] sm:$0xff] %v1567_v22  ;;  %2585 = vst [vmem:[#allocation35_spill] sm:$0xff] %v1569_v23  ;;  %v267_v56 = vld [vmem:[%s1445_s3 + $0xf0] sm:$0xff]  ;;  %v268_v57 = vld [vmem:[%s1445_s3 + $0xf8] sm:$0xff]  ;;  %v1606_v10 = vsub.f32 %v234_v36, %v266_v47  ;;  %v336_v16 = vand.u32 2147483647, %v1502_v41 }
  0x6d   : > { %2586 = vst [vmem:[#allocation36_spill] sm:$0xff] %v1572_v25  ;;  %2587 = vst [vmem:[#allocation37_spill] sm:$0xff] %v1574_v26  ;;  %v1611_v58 = vsub.f32 %v235_v37, %v267_v56  ;;  %v340_v3 = vand.u32 2147483647, %v1516_v51  ;;  %v1616_v60 = vsub.f32 %v236_v46, %v268_v57  ;;  %v341_v55 = vand.u32 2147483647, %v1518_v52 }
  0x6e   : > { %2588 = vst [vmem:[#allocation38_spill] sm:$0xff] %v1576_v27  ;;  %2589 = vst [vmem:[#allocation39_spill] sm:$0xff] %v1579_v29  ;;  %v342_v36 = vand.u32 2147483647, %v1520_v53  ;;  %v343_v47 = vand.u32 2147483647, %v1529_v61 }
  0x6f   : > { %2590 = vst [vmem:[#allocation40_spill] sm:$0xff] %v1606_v10  ;;  %2591 = vst [vmem:[#allocation41_spill] sm:$0xff] %v1611_v58  ;;  %v345_v37 = vand.u32 2147483647, %v1533_v63  ;;  %v365_v56 = vsub.f32 0.0, %v333_v8  ;;  %v366_v57 = vsub.f32 0.0, %v334_v9 }
  0x70   : > { %2592 = vst [vmem:[#allocation42_spill] sm:$0xff] %v1616_v60  ;;  %v346_v45 = vand.u32 2147483647, %v1539_v4  ;;  %v347_v46 = vand.u32 2147483647, %v1541_v5  ;;  %v367_v35 = vsub.f32 0.0, %v335_v15 }
  0x71   : > { %v349_v38 = vand.u32 2147483647, %v1549_v11  ;;  %v350_v31 = vand.u32 2147483647, %v1551_v12  ;;  %v351_v8 = vand.u32 2147483647, %v1553_v13 }
  0x72   : > { %v368_v30 = vsub.f32 0.0, %v336_v16  ;;  %v352_v28 = vand.u32 2147483647, %v1558_v17  ;;  %v369_v24 = vsub.f32 0.0, %v337_v59  ;;  %v397_v9 = vmul.f32 1.442695, %v365_v56 }
  0x73   : > { %v353_v20 = vand.u32 2147483647, %v1560_v18  ;;  %v370_v14 = vsub.f32 0.0, %v338_v1  ;;  %v399_v7 = vmul.f32 1.442695, %v366_v57  ;;  %v371_v0 = vsub.f32 0.0, %v339_v2 }
  0x74   : > { %v354_v50 = vand.u32 2147483647, %v1562_v19  ;;  %v401_v54 = vmul.f32 1.442695, %v367_v35  ;;  %v355_v48 = vand.u32 2147483647, %v1565_v21  ;;  %999 = vpow2.f32 %v397_v9 }
  0x75   : > { %v372_v13 = vsub.f32 0.0, %v340_v3  ;;  %v403_v17 = vmul.f32 1.442695, %v368_v30  ;;  %v356_v59 = vand.u32 2147483647, %v1567_v22  ;;  %v373_v56 = vsub.f32 0.0, %v341_v55 }
  0x76   : > { %v405_v40 = vmul.f32 1.442695, %v369_v24  ;;  %v357_v1 = vand.u32 2147483647, %v1569_v23  ;;  %v374_v57 = vsub.f32 0.0, %v342_v36  ;;  %1001 = vpow2.f32 %v399_v7 }
  0x77   : > { %v407_v15 = vmul.f32 1.442695, %v370_v14  ;;  %v358_v19 = vand.u32 2147483647, %v1572_v25  ;;  %v375_v2 = vsub.f32 0.0, %v343_v47  ;;  %1003 = vpow2.f32 %v401_v54 }
  0x78   : > { %v409_v35 = vmul.f32 1.442695, %v371_v0  ;;  %v359_v16 = vand.u32 2147483647, %v1574_v26  ;;  %v376_v21 = vsub.f32 0.0, %v344_v49  ;;  %1005 = vpow2.f32 %v403_v17 }
  0x79   : > { %v411_v30 = vmul.f32 1.442695, %v372_v13  ;;  %v360_v3 = vand.u32 2147483647, %v1576_v27  ;;  %v377_v55 = vsub.f32 0.0, %v345_v37  ;;  %1007 = vpow2.f32 %v405_v40 }
  0x7a   : > { %v413_v24 = vmul.f32 1.442695, %v373_v56  ;;  %v361_v9 = vand.u32 2147483647, %v1579_v29  ;;  %v378_v36 = vsub.f32 0.0, %v346_v45  ;;  %1009 = vpow2.f32 %v407_v15 }
  0x7b   : > { %v415_v7 = vmul.f32 1.442695, %v374_v57  ;;  %v362_v14 = vand.u32 2147483647, %v1606_v10  ;;  %v379_v47 = vsub.f32 0.0, %v347_v46  ;;  %1011 = vpow2.f32 %v409_v35 }
  0x7c   : > { %v417_v54 = vmul.f32 1.442695, %v375_v2  ;;  %v363_v0 = vand.u32 2147483647, %v1611_v58  ;;  %v380_v49 = vsub.f32 0.0, %v348_v39  ;;  %1013 = vpow2.f32 %v411_v30 }
  0x7d   : > { %v419_v13 = vmul.f32 1.442695, %v376_v21  ;;  %v364_v17 = vand.u32 2147483647, %v1616_v60  ;;  %v381_v37 = vsub.f32 0.0, %v349_v38  ;;  %1015 = vpow2.f32 %v413_v24 }
  0x7e   : > { %v421_v40 = vmul.f32 1.442695, %v377_v55  ;;  %v382_v56 = vsub.f32 0.0, %v350_v31  ;;  %v383_v29 = vsub.f32 0.0, %v351_v8  ;;  %1017 = vpow2.f32 %v415_v7  ;;  %v1650_v15 = vpop.eup %999 }
  0x7f   : > { %v423_v45 = vmul.f32 1.442695, %v378_v36  ;;  %v384_v57 = vsub.f32 0.0, %v352_v28  ;;  %v385_v46 = vsub.f32 0.0, %v353_v20  ;;  %1019 = vpow2.f32 %v417_v54 }
  0x80   : > { %v425_v2 = vmul.f32 1.442695, %v379_v47  ;;  %v1652_v35 = vpop.eup %1001  ;;  %v386_v39 = vsub.f32 0.0, %v354_v50  ;;  %v387_v30 = vsub.f32 0.0, %v355_v48  ;;  %1021 = vpow2.f32 %v419_v13 }
  0x81   : > { %v427_v21 = vmul.f32 1.442695, %v380_v49  ;;  %v1654_v60 = vpop.eup %1003  ;;  %v388_v38 = vsub.f32 0.0, %v356_v59  ;;  %v389_v55 = vsub.f32 0.0, %v357_v1  ;;  %1023 = vpow2.f32 %v421_v40 }
  0x82   : > { %v429_v31 = vmul.f32 1.442695, %v381_v37  ;;  %v1656_v8 = vpop.eup %1005  ;;  %v390_v24 = vsub.f32 0.0, %v358_v19  ;;  %v391_v36 = vsub.f32 0.0, %v359_v16  ;;  %1025 = vpow2.f32 %v423_v45 }
  0x83   : > { %v431_v20 = vmul.f32 1.442695, %v382_v56  ;;  %v1658_v28 = vpop.eup %1007  ;;  %v392_v7 = vsub.f32 0.0, %v360_v3  ;;  %v393_v47 = vsub.f32 0.0, %v361_v9  ;;  %1027 = vpow2.f32 %v425_v2 }
  0x84   : > { %v433_v48 = vmul.f32 1.442695, %v383_v29  ;;  %v1660_v50 = vpop.eup %1009  ;;  %v394_v54 = vsub.f32 0.0, %v362_v14  ;;  %v395_v49 = vsub.f32 0.0, %v363_v0  ;;  %1029 = vpow2.f32 %v427_v21 }
  0x85   : > { %v435_v59 = vmul.f32 1.442695, %v384_v57  ;;  %v1662_v1 = vpop.eup %1011  ;;  %v396_v13 = vsub.f32 0.0, %v364_v17  ;;  %1031 = vpow2.f32 %v429_v31  ;;  %v437_v19 = vmul.f32 1.442695, %v385_v46 }
  0x86   : > { %v464_v16 = vmul.f32 -0.5, %v1650_v15  ;;  %v1665_v37 = vpop.eup %1013  ;;  %1033 = vpow2.f32 %v431_v20  ;;  %v439_v3 = vmul.f32 1.442695, %v386_v39  ;;  %v441_v9 = vmul.f32 1.442695, %v387_v30 }
  0x87   : > { %v443_v40 = vmul.f32 1.442695, %v388_v38  ;;  %v1667_v29 = vpop.eup %1015  ;;  %1035 = vpow2.f32 %v433_v48  ;;  %v445_v14 = vmul.f32 1.442695, %v389_v55  ;;  %v447_v0 = vmul.f32 1.442695, %v390_v24 }
  0x88   : > { %v473_v56 = vmul.f32 -0.5, %v1652_v35  ;;  %v1670_v45 = vpop.eup %1017  ;;  %1037 = vpow2.f32 %v435_v59  ;;  %v449_v17 = vmul.f32 1.442695, %v391_v36  ;;  %v451_v57 = vmul.f32 1.442695, %v392_v7 }
  0x89   : > { %v453_v46 = vmul.f32 1.442695, %v393_v47  ;;  %v1672_v2 = vpop.eup %1019  ;;  %1039 = vpow2.f32 %v437_v19  ;;  %v455_v21 = vmul.f32 1.442695, %v394_v54  ;;  %v465_v39 = vadd.f32 1.0, %v464_v16 }
  0x8a   : > { %v482_v30 = vmul.f32 -0.5, %v1654_v60  ;;  %v1675_v38 = vpop.eup %1021  ;;  %1041 = vpow2.f32 %v439_v3  ;;  %v457_v55 = vmul.f32 1.442695, %v395_v49  ;;  %v459_v31 = vmul.f32 1.442695, %v396_v13 }
  0x8b   : > { %v491_v24 = vmul.f32 -0.5, %v1656_v8  ;;  %v1678_v20 = vpop.eup %1023  ;;  %1043 = vpow2.f32 %v441_v9  ;;  %v461_v36 = vadd.f32 1.0, %v1650_v15  ;;  %v474_v47 = vadd.f32 1.0, %v473_v56 }
  0x8c   : > { %v1682_v48 = vpop.eup %1025  ;;  %1045 = vpow2.f32 %v443_v40  ;;  %v470_v54 = vadd.f32 1.0, %v1652_v35  ;;  %v500_v49 = vmul.f32 -0.5, %v1658_v28  ;;  %v1690_v19 = vmul.f32 %v1650_v15, %v465_v39 }
  0x8d   : > { %v1687_v13 = vpop.eup %1027  ;;  %1047 = vpow2.f32 %v445_v14  ;;  %v479_v16 = vadd.f32 1.0, %v1654_v60  ;;  %v483_v3 = vadd.f32 1.0, %v482_v30  ;;  %v492_v56 = vadd.f32 1.0, %v491_v24 }
  0x8e   : > { %v1693_v9 = vpop.eup %1029  ;;  %1049 = vpow2.f32 %v447_v0  ;;  %v509_v7 = vmul.f32 -0.5, %v1660_v50  ;;  %v1700_v58 = vmul.f32 %v1652_v35, %v474_v47  ;;  %v488_v14 = vadd.f32 1.0, %v1656_v8 }
  0x8f   : > { %v1697_v59 = vpop.eup %1031  ;;  %1051 = vpow2.f32 %v449_v17  ;;  %v518_v39 = vmul.f32 -0.5, %v1662_v1  ;;  %v497_v30 = vadd.f32 1.0, %v1658_v28  ;;  %v501_v24 = vadd.f32 1.0, %v500_v49 }
  0x90   : > { %v1704_v10 = vpop.eup %1033  ;;  %1053 = vpow2.f32 %v451_v57  ;;  %v1711_v17 = vmul.f32 %v1654_v60, %v483_v3  ;;  %v527_v27 = vmul.f32 -0.5, %v1665_v37  ;;  %v1718_v57 = vmul.f32 %v1656_v8, %v492_v56 }
  0x91   : > { %v1708_v40 = vpop.eup %1035  ;;  %1055 = vpow2.f32 %v453_v46  ;;  %v506_v0 = vadd.f32 1.0, %v1660_v50  ;;  %v510_v25 = vadd.f32 1.0, %v509_v7  ;;  %v519_v3 = vadd.f32 1.0, %v518_v39 }
  0x92   : > { %2593 = vst [vmem:[#allocation43_spill] sm:$0xff] %v1711_v17  ;;  %v1715_v26 = vpop.eup %1037  ;;  %1057 = vpow2.f32 %v455_v21  ;;  %v536_v23 = vmul.f32 -0.5, %v1667_v29  ;;  %v1728_v22 = vmul.f32 %v1658_v28, %v501_v24  ;;  %v515_v21 = vadd.f32 1.0, %v1662_v1 }
  0x93   : > { %v1721_v49 = vpop.eup %1039  ;;  %1059 = vpow2.f32 %v457_v55  ;;  %v545_v56 = vmul.f32 -0.5, %v1670_v45  ;;  %v524_v7 = vadd.f32 1.0, %v1665_v37  ;;  %v528_v39 = vadd.f32 1.0, %v527_v27 }
  0x94   : > { %v1725_v47 = vpop.eup %1041  ;;  %1061 = vpow2.f32 %v459_v31  ;;  %2594 = vst [vmem:[#allocation44_spill] sm:$0xff] %v1728_v22  ;;  %v1739_v31 = vmul.f32 %v1660_v50, %v510_v25  ;;  %v554_v12 = vmul.f32 -0.5, %v1672_v2  ;;  %v533_v55 = vadd.f32 1.0, %v1667_v29 }
  0x95   : > { %v1732_v18 = vpop.eup %1043  ;;  %1063 = vlog2.f32 %v461_v36  ;;  %v1746_v36 = vmul.f32 %v1662_v1, %v519_v3  ;;  %v537_v6 = vadd.f32 1.0, %v536_v23  ;;  %v542_v25 = vadd.f32 1.0, %v1670_v45 }
  0x96   : > { %v1736_v46 = vpop.eup %1045  ;;  %1065 = vlog2.f32 %v470_v54  ;;  %v546_v5 = vadd.f32 1.0, %v545_v56  ;;  %v1756_v4 = vmul.f32 %v1665_v37, %v528_v39  ;;  %v563_v3 = vmul.f32 -0.5, %v1675_v38 }
  0x97   : > { %v1743_v11 = vpop.eup %1047  ;;  %1067 = vlog2.f32 %v479_v16  ;;  %2595 = vst [vmem:[#allocation45_spill] sm:$0xff] %v1746_v36  ;;  %v551_v23 = vadd.f32 1.0, %v1672_v2  ;;  %v572_v54 = vmul.f32 -0.5, %v1678_v20  ;;  %v557_v56 = vand.u32 2147483647, %v1672_v2 }
  0x98   : > { %v1749_v27 = vpop.eup %1049  ;;  %1069 = vlog2.f32 %v488_v14  ;;  %2596 = vst [vmem:[#allocation46_spill] sm:$0xff] %v1756_v4  ;;  %v555_v14 = vadd.f32 1.0, %v554_v12  ;;  %v581_v39 = vmul.f32 -0.5, %v1682_v48  ;;  %v560_v12 = vadd.f32 1.0, %v1675_v38 }
  0x99   : > { %v1753_v24 = vpop.eup %1051  ;;  %1071 = vlog2.f32 %v497_v30  ;;  %v1767_v30 = vmul.f32 %v1667_v29, %v537_v6  ;;  %v2604_v52 = vand.u32 2147483647, %v1652_v35  ;;  %v2605_v51 = vmov 0 }
  0x9a   : > { %v1760_v63 = vpop.eup %1053  ;;  %1073 = vlog2.f32 %v506_v0  ;;  %v1774_v0 = vmul.f32 %v1670_v45, %v546_v5  ;;  %v564_v5 = vadd.f32 1.0, %v563_v3  ;;  %v590_v61 = vmul.f32 -0.5, %v1687_v13 }
  0x9b   : > { %2597 = vst [vmem:[#allocation47_spill] sm:$0xff] %v1760_v63  ;;  %v1764_v62 = vpop.eup %1055  ;;  %1075 = vlog2.f32 %v515_v21  ;;  %v2601_v21 = vand.u32 2147483647, %v1650_v15  ;;  %vm1788_vm1 = vcmp.lt.f32.partialorder %v2604_v52, 0.0004427343  ;;  %v1803_v52 = vmul.f32 %v1672_v2, %v555_v14 }
  0x9c   : > { %2598 = vst [vmem:[#allocation48_spill] sm:$0xff] %v1764_v62  ;;  %v1771_v16 = vpop.eup %1057  ;;  %1077 = vlog2.f32 %v524_v7  ;;  %v2606_v51 = vsel %vm1788_vm1, 4294967295, %v2605_v51  ;;  %v569_v7 = vadd.f32 1.0, %v1678_v20  ;;  %v2609_v15 = vand.u32 2147483647, %v1654_v60 }
  0x9d   : > { %2599 = vst [vmem:[#allocation49_spill] sm:$0xff] %v1771_v16  ;;  %v1778_v53 = vpop.eup %1059  ;;  %vm1782_vm0 = vcmp.lt.f32.partialorder %v2601_v21, 0.0004427343  ;;  %2607 = vst [vmem:[#allocation51_spill] sm:$0xff] %v2606_v51  ;;  %1079 = vlog2.f32 %v533_v55  ;;  %v573_v35 = vadd.f32 1.0, %v572_v54  ;;  %v578_v55 = vadd.f32 1.0, %v1682_v48 }
  0x9e   : > { %2600 = vst [vmem:[#allocation50_spill] sm:$0xff] %v1778_v53  ;;  %v1794_v44 = vpop.eup %1061  ;;  %vm1798_vm2 = vcmp.lt.f32.partialorder %v2609_v15, 0.0004427343  ;;  %1081 = vlog2.f32 %v542_v25  ;;  %v2612_v43 = vand.u32 2147483647, %v1656_v8  ;;  %v2616_v15 = vmov 0 }
  0x9f   : > { %2608 = vst [vmem:[#allocation52_spill] sm:$0xff] %v1794_v44  ;;  %v1064_v3 = vpop.eup %1063  ;;  %v2615_v60 = vand.u32 2147483647, %v1658_v28  ;;  %1083 = vlog2.f32 %v551_v23  ;;  %v582_v25 = vadd.f32 1.0, %v581_v39  ;;  %v587_v2 = vadd.f32 1.0, %v1687_v13 }
  0xa0   : > { %vm1808_vm3 = vcmp.lt.f32.partialorder %v2612_v43, 0.0004427343  ;;  %v599_v54 = vmul.f32 -0.5, %v1693_v9  ;;  %v1066_v14 = vpop.eup %1065  ;;  %v2618_v41 = vand.u32 2147483647, %v1660_v50  ;;  %v2619_v43 = vmov 0 }
  0xa1   : > { %vm1814_vm4 = vcmp.lt.f32.partialorder %v2615_v60, 0.0004427343  ;;  %1085 = vlog2.f32 %v560_v12  ;;  %v575_v8 = vand.u32 2147483647, %v1678_v20  ;;  %v596_v28 = vadd.f32 1.0, %v1693_v9  ;;  %v1068_v23 = vpop.eup %1067 }
  0xa2   : > { %v2617_v15 = vsel %vm1814_vm4, 4294967295, %v2616_v15  ;;  %vm1822_vm5 = vcmp.lt.f32.partialorder %v2618_v41, 0.0004427343  ;;  %v608_v60 = vmul.f32 -0.5, %v1697_v59  ;;  %v2621_v39 = vand.u32 2147483647, %v1662_v1  ;;  %v1070_v33 = vpop.eup %1069 }
  0xa3   : > { %v2620_v43 = vsel %vm1822_vm5, 4294967295, %v2619_v43  ;;  %v2622_v34 = vmov 0  ;;  %v1836_v50 = vmul.f32 %v1675_v38, %v564_v5  ;;  %1087 = vlog2.f32 %v569_v7  ;;  %v1072_v53 = vpop.eup %1071 }
  0xa4   : > { %vm1831_vm6 = vcmp.lt.f32.partialorder %v2621_v39, 0.0004427343  ;;  %v591_v41 = vadd.f32 1.0, %v590_v61  ;;  %v605_v12 = vadd.f32 1.0, %v1697_v59  ;;  %v2625_v32 = vand.u32 2147483647, %v1665_v37 }
  0xa5   : > { %v2623_v34 = vsel %vm1831_vm6, 4294967295, %v2622_v34  ;;  %v1846_v1 = vmul.f32 %v1678_v20, %v573_v35  ;;  %1089 = vlog2.f32 %v578_v55  ;;  %v584_v39 = vand.u32 2147483647, %v1682_v48 }
  0xa6   : > { %2624 = vst [vmem:[#allocation53_spill] sm:$0xff] %v2623_v34  ;;  %vm1841_vm7 = vcmp.lt.f32.partialorder %v2625_v32, 0.0004427343  ;;  %v614_v5 = vadd.f32 1.0, %v1704_v10  ;;  %v1851_v61 = vmul.f32 %v1682_v48, %v582_v25  ;;  %1091 = vlog2.f32 %v587_v2  ;;  %v1074_v32 = vpop.eup %1073 }
  0xa7   : > { %2628 = vst [vmem:[#allocation54_spill] sm:$0xff] %v1846_v1  ;;  %v593_v7 = vand.u32 2147483647, %v1687_v13  ;;  %v600_v37 = vadd.f32 1.0, %v599_v54  ;;  %v1854_v16 = vmul.f32 0.6931472, %v1064_v3  ;;  %1093 = vlog2.f32 %v596_v28  ;;  %v1076_v63 = vpop.eup %1075 }
  0xa8   : > { %2629 = vst [vmem:[#allocation55_spill] sm:$0xff] %v1851_v61  ;;  %v1856_v62 = vmul.f32 0.6931472, %v1066_v14  ;;  %v2630_v20 = vand.u32 2147483647, %v1667_v29  ;;  %v2631_v35 = vmov 0  ;;  %v1877_v29 = vmul.f32 %v1687_v13, %v591_v41  ;;  %v1078_v14 = vpop.eup %1077 }
  0xa9   : > { %v609_v55 = vadd.f32 1.0, %v608_v60  ;;  %v1864_v48 = vmul.f32 0.6931472, %v1068_v23  ;;  %v2634_v25 = vand.u32 2147483647, %v1670_v45  ;;  %1095 = vlog2.f32 %v605_v12  ;;  %v1080_v23 = vpop.eup %1079 }
  0xaa   : > { %vm1860_vm8 = vcmp.lt.f32.partialorder %v2630_v20, 0.0004427343  ;;  %vm1872_vm10 = vcmp.lt.f32.partialorder %v557_v56, 0.0004427343  ;;  %2639 = vst [vmem:[#allocation57_spill] sm:$0xff] %v1877_v29  ;;  %1097 = vlog2.f32 %v614_v5  ;;  %v617_v45 = vmul.f32 -0.5, %v1704_v10  ;;  %v1082_v12 = vpop.eup %1081 }
  0xab   : > { %v2632_v35 = vsel %vm1860_vm8, 4294967295, %v2631_v35  ;;  %2633 = vst [vmem:[#allocation56_spill] sm:$0xff] %v1864_v48  ;;  %vm1868_vm9 = vcmp.lt.f32.partialorder %v2634_v25, 0.0004427343  ;;  %v602_v54 = vand.u32 2147483647, %v1693_v9 }
  0xac   : > { %v1880_v28 = vmul.f32 0.6931472, %v1070_v33  ;;  %v1882_v60 = vmul.f32 0.6931472, %v1072_v53  ;;  %v1885_v20 = vmul.f32 0.6931472, %v1074_v32  ;;  %v1898_v33 = vmul.f32 %v1693_v9, %v600_v37  ;;  %v1084_v32 = vpop.eup %1083 }
  0xad   : > { %v2643_v56 = vand.u32 2147483647, %v1675_v38  ;;  %vm1893_vm12 = vcmp.lt.f32.partialorder %v575_v8, 0.0004427343  ;;  %v2646_v13 = vmov 0  ;;  %v623_v41 = vadd.f32 1.0, %v1708_v40  ;;  %v1086_v8 = vpop.eup %1085 }
  0xae   : > { %2640 = vst [vmem:[#allocation58_spill] sm:$0xff] %v1880_v28  ;;  %2641 = vst [vmem:[#allocation59_spill] sm:$0xff] %v1882_v60  ;;  %v2647_v13 = vsel %vm1893_vm12, 4294967295, %v2646_v13  ;;  %v611_v53 = vand.u32 2147483647, %v1697_v59  ;;  %v2650_v9 = vmov 0  ;;  %v1917_v37 = vmul.f32 %v1697_v59, %v609_v55  ;;  %v1088_v17 = vpop.eup %1087 }
  0xaf   : > { %2642 = vst [vmem:[#allocation60_spill] sm:$0xff] %v1885_v20  ;;  %vm1889_vm11 = vcmp.lt.f32.partialorder %v2643_v56, 0.0004427343  ;;  %2648 = vst [vmem:[#allocation61_spill] sm:$0xff] %v1898_v33  ;;  %v1910_v5 = vmul.f32 0.6931472, %v1076_v63  ;;  %1099 = vlog2.f32 %v623_v41  ;;  %v1090_v59 = vpop.eup %1089 }
  0xb0   : > { %vm1912_vm13 = vcmp.lt.f32.partialorder %v584_v39, 0.0004427343  ;;  %2653 = vst [vmem:[#allocation64_spill] sm:$0xff] %v1917_v37  ;;  %v1923_v38 = vmul.f32 0.6931472, %v1078_v14  ;;  %v626_v63 = vmul.f32 -0.5, %v1708_v40  ;;  %v1092_v39 = vpop.eup %1091 }
  0xb1   : > { %2649 = vst [vmem:[#allocation62_spill] sm:$0xff] %v1910_v5  ;;  %v2651_v9 = vsel %vm1912_vm13, 4294967295, %v2650_v9  ;;  %v620_v51 = vand.u32 2147483647, %v1704_v10  ;;  %vm1935_vm14 = vcmp.lt.f32.partialorder %v593_v7, 0.0004427343 }
  0xb2   : > { %2652 = vst [vmem:[#allocation63_spill] sm:$0xff] %v2651_v9  ;;  %2654 = vst [vmem:[#allocation65_spill] sm:$0xff] %v1923_v38  ;;  %v2655_v55 = vmov 0  ;;  %vm1939_vm15 = vcmp.lt.f32.partialorder %v602_v54, 0.0004427343  ;;  %v2658_v14 = vmov 0 }
  0xb3   : > { %v2656_v55 = vsel %vm1935_vm14, 4294967295, %v2655_v55  ;;  %v2659_v14 = vsel %vm1939_vm15, 4294967295, %v2658_v14  ;;  %v618_v56 = vadd.f32 1.0, %v617_v45  ;;  %v632_v48 = vadd.f32 1.0, %v1715_v26  ;;  %v1094_v45 = vpop.eup %1093  ;;  %v2691_v37 = vld [vmem:[#allocation47_spill] sm:$0xff]  ;;  %v2771_v3 = vld [vmem:[#allocation54_spill] sm:$0xff] }
  0xb4   : > { %2657 = vst [vmem:[#allocation66_spill] sm:$0xff] %v2656_v55  ;;  %2660 = vst [vmem:[#allocation67_spill] sm:$0xff] %v2659_v14  ;;  %v1948_v28 = vmul.f32 0.6931472, %v1080_v23  ;;  %vm1950_vm4 = vcmp.lt.f32.partialorder %v611_v53, 0.0004427343  ;;  %v1096_v36 = vpop.eup %1095 }
  0xb5   : > { %v2661_v7 = vmov 0  ;;  %v635_v54 = vmul.f32 -0.5, %v1715_v26  ;;  %v1959_v60 = vmul.f32 0.6931472, %v1082_v12  ;;  %v1961_v22 = vmul.f32 0.6931472, %v1084_v32  ;;  %v1098_v4 = vpop.eup %1097 }
  0xb6   : > { %v2662_v7 = vsel %vm1950_vm4, 4294967295, %v2661_v7  ;;  %v641_v23 = vadd.f32 1.0, %v1721_v49  ;;  %vm1968_vm5 = vcmp.lt.f32.partialorder %v620_v51, 0.0004427343  ;;  %v2664_v41 = vmov 0 }
  0xb7   : > { %2663 = vst [vmem:[#allocation68_spill] sm:$0xff] %v2662_v7  ;;  %v2665_v41 = vsel %vm1968_vm5, 4294967295, %v2664_v41  ;;  %v627_v20 = vadd.f32 1.0, %v626_v63  ;;  %v629_v34 = vand.u32 2147483647, %v1708_v40  ;;  %v1978_v5 = vmul.f32 %v1704_v10, %v618_v56 }
  0xb8   : > { %2666 = vst [vmem:[#allocation69_spill] sm:$0xff] %v2665_v41  ;;  %v1973_v12 = vmul.f32 0.6931472, %v1086_v8  ;;  %v1975_v32 = vmul.f32 0.6931472, %v1088_v17  ;;  %1101 = vlog2.f32 %v632_v48  ;;  %v636_v63 = vadd.f32 1.0, %v635_v54 }
  0xb9   : > { %2668 = vst [vmem:[#allocation71_spill] sm:$0xff] %v1978_v5  ;;  %v1984_v53 = vmul.f32 0.6931472, %v1090_v59  ;;  %v644_v38 = vmul.f32 -0.5, %v1721_v49  ;;  %1103 = vlog2.f32 %v641_v23  ;;  %v650_v48 = vadd.f32 1.0, %v1725_v47 }
  0xba   : > { %2667 = vst [vmem:[#allocation70_spill] sm:$0xff] %v1975_v32  ;;  %v1996_v8 = vmul.f32 0.6931472, %v1092_v39  ;;  %v1998_v56 = vmul.f32 0.6931472, %v1094_v45  ;;  %v2001_v59 = vmul.f32 %v1708_v40, %v627_v20  ;;  %v2673_v54 = vmov 0  ;;  %v1100_v32 = vpop.eup %1099 }
  0xbb   : > { %2669 = vst [vmem:[#allocation72_spill] sm:$0xff] %v1984_v53  ;;  %vm2003_vm8 = vcmp.lt.f32.partialorder %v629_v34, 0.0004427343  ;;  %v638_v17 = vand.u32 2147483647, %v1715_v26  ;;  %v659_v40 = vadd.f32 1.0, %v1732_v18  ;;  %v2026_v10 = vmul.f32 %v1715_v26, %v636_v63 }
  0xbc   : > { %2670 = vst [vmem:[#allocation73_spill] sm:$0xff] %v1996_v8  ;;  %2671 = vst [vmem:[#allocation74_spill] sm:$0xff] %v1998_v56  ;;  %v2674_v54 = vsel %vm2003_vm8, 4294967295, %v2673_v54  ;;  %v2016_v45 = vmul.f32 0.6931472, %v1096_v36  ;;  %v645_v23 = vadd.f32 1.0, %v644_v38  ;;  %1105 = vlog2.f32 %v650_v48 }
  0xbd   : > { %2672 = vst [vmem:[#allocation75_spill] sm:$0xff] %v2001_v59  ;;  %2675 = vst [vmem:[#allocation76_spill] sm:$0xff] %v2674_v54  ;;  %v2023_v20 = vmul.f32 0.6931472, %v1098_v4  ;;  %v647_v51 = vand.u32 2147483647, %v1721_v49  ;;  %1107 = vlog2.f32 %v659_v40 }
  0xbe   : > { %2676 = vst [vmem:[#allocation77_spill] sm:$0xff] %v2016_v45  ;;  %2678 = vst [vmem:[#allocation79_spill] sm:$0xff] %v2026_v10  ;;  %v653_v39 = vmul.f32 -0.5, %v1725_v47  ;;  %v668_v36 = vadd.f32 1.0, %v1736_v46  ;;  %vm2039_vm13 = vcmp.lt.f32.partialorder %v638_v17, 0.0004427343  ;;  %v2055_v4 = vmul.f32 %v1721_v49, %v645_v23 }
  0xbf   : > { %2677 = vst [vmem:[#allocation78_spill] sm:$0xff] %v2023_v20  ;;  %v2679_v26 = vmov 0  ;;  %v677_v38 = vadd.f32 1.0, %v1743_v11  ;;  %v656_v48 = vand.u32 2147483647, %v1725_v47  ;;  %v662_v9 = vmul.f32 -0.5, %v1732_v18 }
  0xc0   : > { %v2680_v26 = vsel %vm2039_vm13, 4294967295, %v2679_v26  ;;  %2682 = vst [vmem:[#allocation81_spill] sm:$0xff] %v2055_v4  ;;  %v671_v34 = vmul.f32 -0.5, %v1736_v46  ;;  %v686_v56 = vadd.f32 1.0, %v1749_v27  ;;  %v2059_v7 = vmul.f32 0.6931472, %v1100_v32 }
  0xc1   : > { %2681 = vst [vmem:[#allocation80_spill] sm:$0xff] %v2680_v26  ;;  %vm2061_vm4 = vcmp.lt.f32.partialorder %v647_v51, 0.0004427343  ;;  %v2684_v63 = vmov 0  ;;  %v654_v40 = vadd.f32 1.0, %v653_v39  ;;  %1109 = vlog2.f32 %v668_v36  ;;  %v2703_v59 = vld [vmem:[#allocation50_spill] sm:$0xff] }
  0xc2   : > { %v1102_v33 = vpop.eup %1101  ;;  %2683 = vst [vmem:[#allocation82_spill] sm:$0xff] %v2059_v7  ;;  %v2685_v63 = vsel %vm2061_vm4, 4294967295, %v2684_v63  ;;  %v665_v45 = vand.u32 2147483647, %v1732_v18  ;;  %v674_v17 = vand.u32 2147483647, %v1736_v46  ;;  %1111 = vlog2.f32 %v677_v38 }
  0xc3   : > { %2686 = vst [vmem:[#allocation83_spill] sm:$0xff] %v2685_v63  ;;  %v680_v49 = vmul.f32 -0.5, %v1743_v11  ;;  %v1104_v23 = vpop.eup %1103  ;;  %vm2068_vm5 = vcmp.lt.f32.partialorder %v656_v48, 0.0004427343  ;;  %v2687_v20 = vmov 0  ;;  %v663_v32 = vadd.f32 1.0, %v662_v9 }
  0xc4   : > { %v2688_v20 = vsel %vm2068_vm5, 4294967295, %v2687_v20  ;;  %1113 = vlog2.f32 %v686_v56  ;;  %v689_v51 = vmul.f32 -0.5, %v1749_v27  ;;  %v695_v5 = vadd.f32 1.0, %v1753_v24 }
  0xc5   : > { %2689 = vst [vmem:[#allocation84_spill] sm:$0xff] %v2688_v20  ;;  %v2074_v39 = vmul.f32 0.6931472, %v1102_v33  ;;  %v672_v36 = vadd.f32 1.0, %v671_v34  ;;  %v698_v41 = vmul.f32 -0.5, %v1753_v24  ;;  %v704_v38 = vadd.f32 1.0, %v2691_v37 }
  0xc6   : > { %v2083_v14 = vmul.f32 %v1725_v47, %v654_v40  ;;  %v683_v9 = vand.u32 2147483647, %v1743_v11  ;;  %1115 = vlog2.f32 %v695_v5  ;;  %v2086_v56 = vmul.f32 0.6931472, %v1104_v23  ;;  %v1106_v8 = vpop.eup %1105  ;;  %v2697_v5 = vld [vmem:[#allocation48_spill] sm:$0xff] }
  0xc7   : > { %2690 = vst [vmem:[#allocation85_spill] sm:$0xff] %v2074_v39  ;;  %vm2088_vm15 = vcmp.lt.f32.partialorder %v665_v45, 0.0004427343  ;;  %v681_v34 = vadd.f32 1.0, %v680_v49  ;;  %1117 = vlog2.f32 %v704_v38  ;;  %v2093_v29 = vmul.f32 %v1732_v18, %v663_v32  ;;  %v2713_v32 = vld [vmem:[#allocation11_spill] sm:$0xff] }
  0xc8   : > { %2692 = vst [vmem:[#allocation47_spill] sm:$0xff] %v2086_v56  ;;  %vm2095_vm14 = vcmp.lt.f32.partialorder %v674_v17, 0.0004427343  ;;  %v690_v47 = vadd.f32 1.0, %v689_v51  ;;  %v692_v40 = vand.u32 2147483647, %v1749_v27  ;;  %v2106_v49 = vmul.f32 %v1736_v46, %v672_v36  ;;  %v1108_v17 = vpop.eup %1107 }
  0xc9   : > { %v713_v23 = vadd.f32 1.0, %v2697_v5  ;;  %v699_v38 = vadd.f32 1.0, %v698_v41  ;;  %v701_v18 = vand.u32 2147483647, %v1753_v24  ;;  %vm2109_vm8 = vcmp.lt.f32.partialorder %v683_v9, 0.0004427343 }
  0xca   : > { %v707_v51 = vmul.f32 -0.5, %v2691_v37  ;;  %v710_v7 = vand.u32 2147483647, %v2691_v37  ;;  %v2119_v46 = vmul.f32 0.6931472, %v1106_v8  ;;  %v2122_v41 = vmul.f32 %v1743_v11, %v681_v34  ;;  %v2700_v36 = vld [vmem:[#allocation49_spill] sm:$0xff] }
  0xcb   : > { %1119 = vlog2.f32 %v713_v23  ;;  %v722_v9 = vadd.f32 1.0, %v2700_v36  ;;  %v1110_v39 = vpop.eup %1109  ;;  %v2126_v10 = vmul.f32 %v1749_v27, %v690_v47  ;;  %vm2128_vm13 = vcmp.lt.f32.partialorder %v692_v40, 0.0004427343  ;;  %v2750_v56 = vld [vmem:[#allocation18_spill] sm:$0xff] }
  0xcc   : > { %v716_v23 = vmul.f32 -0.5, %v2697_v5  ;;  %v731_v63 = vadd.f32 1.0, %v2703_v59  ;;  %v1112_v45 = vpop.eup %1111  ;;  %v2134_v8 = vmul.f32 0.6931472, %v1108_v17  ;;  %v2137_v11 = vmul.f32 %v1753_v24, %v699_v38  ;;  %v2708_v17 = vld [vmem:[#allocation52_spill] sm:$0xff] }
  0xcd   : > { %vm2139_vm4 = vcmp.lt.f32.partialorder %v701_v18, 0.0004427343  ;;  %v725_v27 = vmul.f32 -0.5, %v2700_v36  ;;  %v708_v40 = vadd.f32 1.0, %v707_v51  ;;  %vm2144_vm12 = vcmp.lt.f32.partialorder %v710_v7, 0.0004427343 }
  0xce   : > { %v1114_v47 = vpop.eup %1113  ;;  %1121 = vlog2.f32 %v722_v9  ;;  %v734_v4 = vmul.f32 -0.5, %v2703_v59  ;;  %v2153_v38 = vmul.f32 0.6931472, %v1110_v39  ;;  %v719_v18 = vand.u32 2147483647, %v2697_v5 }
  0xcf   : > { %v740_v54 = vadd.f32 1.0, %v2708_v17  ;;  %v2157_v51 = vmul.f32 0.6931472, %v1112_v45  ;;  %v717_v7 = vadd.f32 1.0, %v716_v23  ;;  %1123 = vlog2.f32 %v731_v63 }
  0xd0   : > { %v1116_v55 = vpop.eup %1115  ;;  %v743_v9 = vmul.f32 -0.5, %v2708_v17  ;;  %v2160_v61 = vmul.f32 0.6931472, %v1114_v47  ;;  %v726_v1 = vadd.f32 1.0, %v725_v27  ;;  %v728_v20 = vand.u32 2147483647, %v2700_v36 }
  0xd1   : > { %v1118_v53 = vpop.eup %1117  ;;  %1125 = vlog2.f32 %v740_v54  ;;  %v667_v39 = vsel %vm2088_vm15, %v2093_v29, %v2134_v8  ;;  %v2168_v24 = vmul.f32 %v2691_v37, %v708_v40  ;;  %v735_v45 = vadd.f32 1.0, %v734_v4  ;;  %v2776_v54 = vld [vmem:[#allocation63_spill] sm:$0xff] }
  0xd2   : > { %v737_v63 = vand.u32 2147483647, %v2703_v59  ;;  %v676_v23 = vsel %vm2095_vm14, %v2106_v49, %v2153_v38  ;;  %v2175_v27 = vmul.f32 0.6931472, %v1116_v55  ;;  %vm2177_vm5 = vcmp.lt.f32.partialorder %v719_v18, 0.0004427343 }
  0xd3   : > { %v746_v33 = vand.u32 2147483647, %v2708_v17  ;;  %v685_v37 = vsel %vm2109_vm8, %v2122_v41, %v2157_v51  ;;  %v2186_v4 = vmul.f32 0.6931472, %v1118_v53  ;;  %v2189_v8 = vmul.f32 %v2697_v5, %v717_v7  ;;  %v2726_v18 = vld [vmem:[#allocation43_spill] sm:$0xff]  ;;  %v2727_v51 = vld [vmem:[#allocation56_spill] sm:$0xff] }
  0xd4   : > { %v744_v48 = vadd.f32 1.0, %v743_v9  ;;  %v694_v55 = vsel %vm2128_vm13, %v2126_v10, %v2160_v61  ;;  %v2196_v49 = vmul.f32 %v2700_v36, %v726_v1  ;;  %vm2198_vm14 = vcmp.lt.f32.partialorder %v728_v20, 0.0004427343  ;;  %v2718_v1 = vld [vmem:[#allocation12_spill] sm:$0xff] }
  0xd5   : > { %v1120_v29 = vpop.eup %1119  ;;  %v2714_v41 = vmax.f32 %v2713_v32, 0.0  ;;  %v2715_v53 = vsel %vm1782_vm0, %v1690_v19, %v1854_v16  ;;  %v2210_v38 = vmul.f32 %v2703_v59, %v735_v45  ;;  %vm2212_vm8 = vcmp.lt.f32.partialorder %v737_v63, 0.0004427343  ;;  %v2724_v59 = vld [vmem:[#allocation13_spill] sm:$0xff]  ;;  %v2729_v45 = vld [vmem:[#allocation14_spill] sm:$0xff]  ;;  %v2733_v63 = vld [vmem:[#allocation15_spill] sm:$0xff] }
  0xd6   : > { %v715_v40 = vmul.f32 0.6931472, %v1120_v29  ;;  %v2719_v10 = vmax.f32 %v2718_v1, 0.0  ;;  %v2721_v26 = vsel %vm1788_vm1, %v1700_v58, %v1856_v62  ;;  %v703_v19 = vsel %vm2139_vm4, %v2137_v11, %v2175_v27  ;;  %v2731_v58 = vld [vmem:[#allocation58_spill] sm:$0xff]  ;;  %v2737_v29 = vld [vmem:[#allocation59_spill] sm:$0xff]  ;;  %v2739_v1 = vld [vmem:[#allocation16_spill] sm:$0xff] }
  0xd7   : > { %v749_v5 = vadd.f32 %v2715_v53, %v2714_v41  ;;  %vm2227_vm0 = vcmp.lt.f32.partialorder %v746_v33, 0.0004427343  ;;  %v2725_v36 = vmax.f32 %v2724_v59, 0.0  ;;  %v2728_v7 = vsel %vm1798_vm2, %v2726_v18, %v2727_v51  ;;  %v2736_v33 = vld [vmem:[#allocation44_spill] sm:$0xff]  ;;  %v2747_v18 = vld [vmem:[#allocation45_spill] sm:$0xff]  ;;  %v2748_v51 = vld [vmem:[#allocation62_spill] sm:$0xff] }
  0xd8   : > { %v750_v6 = vadd.f32 %v2721_v26, %v2719_v10  ;;  %v2730_v62 = vmax.f32 %v2729_v45, 0.0  ;;  %v2732_v34 = vsel %vm1808_vm3, %v1718_v57, %v2731_v58  ;;  %v2734_v27 = vmax.f32 %v2733_v63, 0.0  ;;  %v1122_v41 = vpop.eup %1121  ;;  %v2742_v57 = vld [vmem:[#allocation60_spill] sm:$0xff]  ;;  %v2744_v26 = vld [vmem:[#allocation17_spill] sm:$0xff] }
  0xd9   : > { %v751_v9 = vadd.f32 %v2728_v7, %v2725_v36  ;;  %vm2735_vm1 = vnez %v2617_v15  ;;  %v712_v53 = vsel %vm2144_vm12, %v2168_v24, %v2186_v4  ;;  %v745_v42 = vmul.f32 %v2708_v17, %v744_v48  ;;  %v2752_v17 = vld [vmem:[#allocation46_spill] sm:$0xff]  ;;  %v2753_v4 = vld [vmem:[#allocation65_spill] sm:$0xff]  ;;  %v2759_v63 = vld [vmem:[#allocation20_spill] sm:$0xff] }
  0xda   : > { %v752_v11 = vadd.f32 %v2732_v34, %v2730_v62  ;;  %v2738_v32 = vsel %vm2735_vm1, %v2736_v33, %v2737_v29  ;;  %v2740_v10 = vmax.f32 %v2739_v1, 0.0  ;;  %vm2741_vm2 = vnez %v2620_v43  ;;  %v2755_v62 = vld [vmem:[#allocation19_spill] sm:$0xff]  ;;  %v2762_v29 = vld [vmem:[#allocation21_spill] sm:$0xff]  ;;  %v2849_v16 = vld [vmem:[#allocation40_spill] sm:$0xff] }
  0xdb   : > { %v753_v21 = vadd.f32 %v2738_v32, %v2734_v27  ;;  %v2743_v20 = vsel %vm2741_vm2, %v1739_v31, %v2742_v57  ;;  %v2745_v59 = vmax.f32 %v2744_v26, 0.0  ;;  %v2749_v7 = vsel %vm1831_vm6, %v2747_v18, %v2748_v51 }
  0xdc   : > { %v754_v15 = vadd.f32 %v2743_v20, %v2740_v10  ;;  %v2751_v24 = vmax.f32 %v2750_v56, 0.0  ;;  %v2754_v48 = vsel %vm1841_vm7, %v2752_v17, %v2753_v4  ;;  %v2756_v58 = vmax.f32 %v2755_v62, 0.0  ;;  %v1124_v10 = vpop.eup %1123  ;;  %v2783_v56 = vld [vmem:[#allocation66_spill] sm:$0xff] }
  0xdd   : > { %v755_v45 = vadd.f32 %v2749_v7, %v2745_v59  ;;  %vm2757_vm3 = vnez %v2632_v35  ;;  %v2760_v27 = vmax.f32 %v2759_v63, 0.0  ;;  %v2761_v33 = vsel %vm1868_vm9, %v1774_v0, %v1959_v60  ;;  %v2768_v60 = vld [vmem:[#allocation23_spill] sm:$0xff]  ;;  %v2774_v59 = vld [vmem:[#allocation24_spill] sm:$0xff]  ;;  %v1126_v51 = vpop.eup %1125  ;;  %v2793_v63 = vld [vmem:[#allocation74_spill] sm:$0xff] }
  0xde   : > { %v756_v43 = vadd.f32 %v2754_v48, %v2751_v24  ;;  %v2758_v31 = vsel %vm2757_vm3, %v1767_v30, %v1948_v28  ;;  %v2763_v32 = vmax.f32 %v2762_v29, 0.0  ;;  %v2764_v1 = vsel %vm1872_vm10, %v1803_v52, %v1961_v22  ;;  %v2765_v28 = vld [vmem:[#allocation22_spill] sm:$0xff]  ;;  %v2785_v24 = vld [vmem:[#allocation57_spill] sm:$0xff]  ;;  %v2795_v29 = vld [vmem:[#allocation27_spill] sm:$0xff] }
  0xdf   : > { %v757_v34 = vadd.f32 %v2758_v31, %v2756_v58  ;;  %v758_v44 = vadd.f32 %v2761_v33, %v2760_v27  ;;  %v721_v30 = vsel %vm2177_vm5, %v2189_v8, %v715_v40  ;;  %v2766_v57 = vmax.f32 %v2765_v28, 0.0  ;;  %v2772_v22 = vld [vmem:[#allocation70_spill] sm:$0xff]  ;;  %v2778_v8 = vld [vmem:[#allocation55_spill] sm:$0xff]  ;;  %v2779_v40 = vld [vmem:[#allocation72_spill] sm:$0xff] }
  0xe0   : > { %v759_v35 = vadd.f32 %v2764_v1, %v2763_v32  ;;  %v2767_v0 = vsel %vm1889_vm11, %v1836_v50, %v1973_v12  ;;  %v2769_v20 = vmax.f32 %v2768_v60, 0.0  ;;  %vm2770_vm4 = vnez %v2647_v13  ;;  %v2781_v50 = vld [vmem:[#allocation25_spill] sm:$0xff]  ;;  %v2788_v48 = vld [vmem:[#allocation26_spill] sm:$0xff]  ;;  %v2790_v58 = vld [vmem:[#allocation67_spill] sm:$0xff] }
  0xe1   : > { %v760_v2 = vadd.f32 %v2767_v0, %v2766_v57  ;;  %v2773_v52 = vsel %vm2770_vm4, %v2771_v3, %v2772_v22  ;;  %v2775_v36 = vmax.f32 %v2774_v59, 0.0  ;;  %vm2777_vm5 = vnez %v2776_v54  ;;  %v2786_v13 = vld [vmem:[#allocation73_spill] sm:$0xff]  ;;  %v2799_v1 = vld [vmem:[#allocation64_spill] sm:$0xff]  ;;  %v2806_v22 = vld [vmem:[#allocation71_spill] sm:$0xff] }
  0xe2   : > { %v761_v26 = vadd.f32 %v2773_v52, %v2769_v20  ;;  %v2780_v18 = vsel %vm2777_vm5, %v2778_v8, %v2779_v40  ;;  %v724_v7 = vmul.f32 0.6931472, %v1122_v41  ;;  %v2782_v12 = vmax.f32 %v2781_v50, 0.0  ;;  %v2792_v31 = vld [vmem:[#allocation61_spill] sm:$0xff]  ;;  %v2797_v41 = vld [vmem:[#allocation68_spill] sm:$0xff]  ;;  %v2807_v52 = vld [vmem:[#allocation78_spill] sm:$0xff] }
  0xe3   : > { %v762_v25 = vadd.f32 %v2780_v18, %v2775_v36  ;;  %vm2784_vm6 = vnez %v2783_v56  ;;  %v2789_v62 = vmax.f32 %v2788_v48, 0.0  ;;  %vm2791_vm7 = vnez %v2790_v58  ;;  %v2800_v28 = vld [vmem:[#allocation77_spill] sm:$0xff]  ;;  %v2802_v60 = vld [vmem:[#allocation28_spill] sm:$0xff]  ;;  %v2813_v18 = vld [vmem:[#allocation75_spill] sm:$0xff] }
  0xe4   : > { %v2787_v17 = vsel %vm2784_vm6, %v2785_v24, %v2786_v13  ;;  %v2794_v27 = vsel %vm2791_vm7, %v2792_v31, %v2793_v63  ;;  %v2796_v32 = vmax.f32 %v2795_v29, 0.0  ;;  %vm2798_vm9 = vnez %v2797_v41  ;;  %v2804_v3 = vld [vmem:[#allocation69_spill] sm:$0xff]  ;;  %v2811_v40 = vld [vmem:[#allocation76_spill] sm:$0xff]  ;;  %v2814_v50 = vld [vmem:[#allocation82_spill] sm:$0xff] }
  0xe5   : > { %v763_v4 = vadd.f32 %v2787_v17, %v2782_v12  ;;  %v764_v33 = vadd.f32 %v2794_v27, %v2789_v62  ;;  %v2801_v57 = vsel %vm2798_vm9, %v2799_v1, %v2800_v28  ;;  %v2803_v20 = vmax.f32 %v2802_v60, 0.0  ;;  %v2809_v54 = vld [vmem:[#allocation29_spill] sm:$0xff]  ;;  %v2816_v24 = vld [vmem:[#allocation30_spill] sm:$0xff]  ;;  %v2818_v17 = vld [vmem:[#allocation80_spill] sm:$0xff] }
  0xe6   : > { %v765_v0 = vadd.f32 %v2801_v57, %v2796_v32  ;;  %vm2805_vm10 = vnez %v2804_v3  ;;  %v2810_v8 = vmax.f32 %v2809_v54, 0.0  ;;  %vm2812_vm11 = vnez %v2811_v40  ;;  %v2820_v48 = vld [vmem:[#allocation79_spill] sm:$0xff]  ;;  %v2821_v62 = vld [vmem:[#allocation85_spill] sm:$0xff]  ;;  %v2837_v40 = vld [vmem:[#allocation34_spill] sm:$0xff] }
  0xe7   : > { %v2808_v59 = vsel %vm2805_vm10, %v2806_v22, %v2807_v52  ;;  %v2815_v12 = vsel %vm2812_vm11, %v2813_v18, %v2814_v50  ;;  %v2817_v13 = vmax.f32 %v2816_v24, 0.0  ;;  %vm2819_vm12 = vnez %v2818_v17  ;;  %v2823_v28 = vld [vmem:[#allocation31_spill] sm:$0xff] }
  0xe8   : > { %v766_v36 = vadd.f32 %v2808_v59, %v2803_v20  ;;  %v767_v56 = vadd.f32 %v2815_v12, %v2810_v8  ;;  %v2822_v58 = vsel %vm2819_vm12, %v2820_v48, %v2821_v62  ;;  %v781_v63 = vadd.f32 %v753_v21, %v749_v5  ;;  %v2825_v60 = vld [vmem:[#allocation83_spill] sm:$0xff]  ;;  %v2827_v20 = vld [vmem:[#allocation81_spill] sm:$0xff]  ;;  %v2830_v59 = vld [vmem:[#allocation32_spill] sm:$0xff] }
  0xe9   : > { %v768_v31 = vadd.f32 %v2822_v58, %v2817_v13  ;;  %v733_v27 = vmul.f32 0.6931472, %v1124_v10  ;;  %v788_v29 = vadd.f32 %v754_v15, %v750_v6  ;;  %v795_v32 = vadd.f32 %v755_v45, %v751_v9  ;;  %v2828_v3 = vld [vmem:[#allocation47_spill] sm:$0xff]  ;;  %v2832_v8 = vld [vmem:[#allocation84_spill] sm:$0xff]  ;;  %v2835_v9 = vld [vmem:[#allocation33_spill] sm:$0xff] }
  0xea   : > { %v802_v41 = vadd.f32 %v756_v43, %v752_v11  ;;  %v742_v1 = vmul.f32 0.6931472, %v1126_v51  ;;  %v2824_v57 = vmax.f32 %v2823_v28, 0.0  ;;  %vm2826_vm13 = vnez %v2825_v60  ;;  %v2839_v12 = vld [vmem:[#allocation35_spill] sm:$0xff] }
  0xeb   : > { %v2829_v22 = vsel %vm2826_vm13, %v2827_v20, %v2828_v3  ;;  %v2831_v54 = vmax.f32 %v2830_v59, 0.0  ;;  %vm2833_vm15 = vnez %v2832_v8  ;;  %v782_v6 = vadd.f32 %v781_v63, %v757_v34 }
  0xec   : > { %v769_v52 = vadd.f32 %v2829_v22, %v2824_v57  ;;  %v2834_v5 = vsel %vm2833_vm15, %v2083_v14, %v2119_v46  ;;  %v2836_v11 = vmax.f32 %v2835_v9, 0.0  ;;  %v789_v45 = vadd.f32 %v788_v29, %v758_v44 }
  0xed   : > { %v770_v21 = vadd.f32 %v2834_v5, %v2831_v54  ;;  %v796_v43 = vadd.f32 %v795_v32, %v759_v35  ;;  %v803_v10 = vadd.f32 %v802_v41, %v760_v2  ;;  %v730_v51 = vsel %vm2198_vm14, %v2196_v49, %v724_v7  ;;  %v2841_v2 = vld [vmem:[#allocation36_spill] sm:$0xff]  ;;  %v2843_v7 = vld [vmem:[#allocation37_spill] sm:$0xff]  ;;  %v2853_v41 = vld [vmem:[#allocation42_spill] sm:$0xff] }
  0xee   : > { %v771_v15 = vadd.f32 %v667_v39, %v2836_v11  ;;  %v2838_v18 = vmax.f32 %v2837_v40, 0.0  ;;  %v2840_v24 = vmax.f32 %v2839_v12, 0.0  ;;  %v783_v14 = vadd.f32 %v782_v6, %v761_v26  ;;  %v2845_v26 = vld [vmem:[#allocation38_spill] sm:$0xff] }
  0xef   : > { %v739_v46 = vsel %vm2212_vm8, %v2210_v38, %v733_v27  ;;  %v790_v34 = vadd.f32 %v789_v45, %v762_v25  ;;  %v797_v39 = vadd.f32 %v796_v43, %v763_v4  ;;  %v804_v44 = vadd.f32 %v803_v10, %v764_v33  ;;  %v2847_v4 = vld [vmem:[#allocation39_spill] sm:$0xff]  ;;  %v2851_v27 = vld [vmem:[#allocation41_spill] sm:$0xff] }
  0xf0   : > { %v772_v50 = vadd.f32 %v676_v23, %v2838_v18  ;;  %v773_v13 = vadd.f32 %v685_v37, %v2840_v24  ;;  %v748_v35 = vsel %vm2227_vm0, %v745_v42, %v742_v1  ;;  %v2842_v47 = vmax.f32 %v2841_v2, 0.0 }
  0xf1   : > { %v2844_v23 = vmax.f32 %v2843_v7, 0.0  ;;  %v784_v37 = vadd.f32 %v783_v14, %v765_v0  ;;  %v2846_v48 = vmax.f32 %v2845_v26, 0.0  ;;  %v791_v61 = vadd.f32 %v790_v34, %v766_v36 }
  0xf2   : > { %v774_v49 = vadd.f32 %v694_v55, %v2842_v47  ;;  %v798_v38 = vadd.f32 %v797_v39, %v767_v56  ;;  %v805_v25 = vadd.f32 %v804_v44, %v768_v31  ;;  %v2848_v33 = vmax.f32 %v2847_v4, 0.0 }
  0xf3   : > { %v775_v17 = vadd.f32 %v703_v19, %v2844_v23  ;;  %v776_v62 = vadd.f32 %v712_v53, %v2846_v48  ;;  %v2850_v42 = vmax.f32 %v2849_v16, 0.0  ;;  %v2852_v29 = vmax.f32 %v2851_v27, 0.0 }
  0xf4   : > { %v777_v58 = vadd.f32 %v721_v30, %v2848_v33  ;;  %v785_v32 = vadd.f32 %v784_v37, %v769_v52  ;;  %v2854_v1 = vmax.f32 %v2853_v41, 0.0  ;;  %v792_v0 = vadd.f32 %v791_v61, %v770_v21 }
  0xf5   : > { %v778_v63 = vadd.f32 %v730_v51, %v2850_v42  ;;  %v779_v55 = vadd.f32 %v739_v46, %v2852_v29  ;;  %v799_v28 = vadd.f32 %v798_v38, %v771_v15  ;;  %v806_v57 = vadd.f32 %v805_v25, %v772_v50 }
  0xf6   : > { %v780_v19 = vadd.f32 %v748_v35, %v2854_v1  ;;  %v786_v53 = vadd.f32 %v785_v32, %v773_v13  ;;  %v793_v30 = vadd.f32 %v792_v0, %v774_v49 }
  0xf7   : > { %v800_v36 = vadd.f32 %v799_v28, %v775_v17  ;;  %v807_v56 = vadd.f32 %v806_v57, %v776_v62 }
  0xf8   : > { %v787_v31 = vadd.f32 %v786_v53, %v777_v58  ;;  %v794_v60 = vadd.f32 %v793_v30, %v778_v63 }
  0xf9   : > { %v801_v20 = vadd.f32 %v800_v36, %v779_v55  ;;  %v808_v3 = vadd.f32 %v807_v56, %v780_v19 }
  0xfa   : > { %809 = vst [vmem:[%s201_s6] sm:$0xff] %v787_v31  ;;  %810 = vst [vmem:[%s201_s6 + $0x8] sm:$0xff] %v794_v60 }
  0xfb   : > { %811 = vst [vmem:[%s201_s6 + $0x10] sm:$0xff] %v801_v20  ;;  %812 = vst [vmem:[%s201_s6 + $0x18] sm:$0xff] %v808_v3 }
  0xfc   : > { %1200 = shalt.err (!%p1197_p11)
}
  0xfd   : > { %s1201_s8 = scalar_lea.hbm %s2414_s24, 512  ;;  %s1205_s19 = scalar_lea.hbm %s2462_s2, 1024 }
  0xfe   : > { %p1202_p3 = scmp.ne.s32.totalorder %s2414_s24, %s1201_s8  ;;  %p1206_p2 = scmp.lt.u32.totalorder %s2414_s24, %s2462_s2 }
  0xff   : > { %p1207_p4 = scmp.lt.u32.totalorder %s1205_s19, %s1201_s8  ;;  %p1209_p13 = scmp.lt.u32.totalorder %s1201_s8, %s2414_s24 }
 0x100   : > { %p1203_p8 = pnand %p1202_p3, %p2855_p1 }
 0x101   : > { %p1208_p6 = por %p1207_p4, %p1206_p2 }
 0x102   : > { %p1204_p0 = pneg %p1203_p8 }
 0x103   : > { %p1210_p12 = por %p1209_p13, %p1208_p6 }
 0x105   : > { %p1211_p10 = pnand %p1210_p12, %p1204_p0 }
 0x107   : > { %1214 = shalt.err (!%p1211_p10)
}
 0x108   : > { %s1264_s29 = smov 128   ;;  %s1265_s20 = smov 8  }
 0x109   : > { %948 = dma.vmem_to_hbm [thread:$0]  (%p2855_p1), %s2416_s14, 512, %s2414_s24, %s814_s13, %s1264_s29, %s1264_s29, %s1265_s20  }
 0x10a PF: > { %s842_s5 = sand.u32 1, %s1245_s9   ;;  %p2856_p5 = scmp.ne.s32.totalorder %s2557_s22, 0 }
 0x10b   : > { %p2857_p7 = scmp.ge.s32.totalorder %s1257_s12, 2  ;;  %s843_s6 = scalar_lea.sflag [#allocation4], %s842_s5 }
 0x10d   : > { %p958_p9 = pnand %p2857_p7, %p2856_p5 }
 0x10f   : > { %1240 = dma.done.wait (!%p958_p9), %s843_s6, 512  }
 0x110   : > { %1242 = vsyncadd (!%p958_p9), %s843_s6, 4294966784  ;;  %p18_p11 = scmp.ge.s32.totalorder %s1306_s15, 4   ;;  %s2858_s9 = smov %s1249_s10 }
 0x111   : > { %s2859_s10 = smov %s1253_s11  ;;  %s2860_s11 = smov %s1318_s18 }
 0x112   : > { %s2861_s12 = smov %s1306_s15  ;;  %20 = sbr.rel (!%p18_p11) target bundleno = 7 (0x7), region = 86 }
 0x119   :  { %848 = vsyncpa [#allocation3], 1 }
 0x11a   :  { %850 = vsyncpa [#allocation3 + $0x1], 1 }
 0x11b   :  { %851 = vsyncpa [#allocation6], 1 }
 0x11c   :  { %853 = vsyncpa [#allocation6 + $0x1], 1 }
 0x11d   :  { %854 = vsyncpa [#allocation4], 1 }
 0x11e   :  { %856 = vsyncpa [#allocation4 + $0x1], 1 }

</bundles_post_ra>
